<compile_context>
chip_gen: v7x
topology: tpu7x:2x2x1
jax: 0.10.0
libtpu: 0.0.40
codegen_flags: <defaults>
</compile_context>

<pallas_src>
import functools

import jax
import jax.numpy as jnp
import numpy as np
from jax import lax
from jax.experimental import pallas as pl
from jax.experimental.pallas import tpu as pltpu

BN_EPS = 1e-5


def _round_up(a, m):
    return (a + m - 1) // m * m


def _fc_bn_kernel(x_ref, wt_ref, b_ref, g_ref, beta_ref, o_ref, *, n_true):
    """One (Cout-tile j, Cin-tile k) grid step.

    x_ref:    (N_pad, TK)   K-slice of activations
    wt_ref:   (TK, TC)      transposed weight tile (Cin, Cout layout)
    b/g/beta: (1, TC)       per-feature params for this Cout tile
    o_ref:    (N_pad, TC)   f32 output block, resident across the K axis (doubles as accumulator)
    """
    k = pl.program_id(1)

    # Linear partial product on the MXU (f32 accumulation regardless of input dtype).
    psum = jnp.dot(x_ref[...], wt_ref[...], preferred_element_type=jnp.float32)

    @pl.when(k == 0)
    def _init():
        o_ref[...] = psum

    @pl.when(k != 0)
    def _accumulate():
        o_ref[...] += psum

    @pl.when(k == pl.num_programs(1) - 1)
    def _finalize():
        # Bias + ReLU in f32 (keeps the VPU path efficient on v5e too).
        y = jnp.maximum(o_ref[...] + b_ref[...], 0.0)

        n_pad = y.shape[0]
        inv_n = jnp.float32(1.0 / n_true)
        if n_pad == n_true:
            s1 = jnp.sum(y, axis=0, keepdims=True)
            s2 = jnp.sum(y * y, axis=0, keepdims=True)
        else:
            # Zero-padded batch rows must not contribute to the batch statistics.
            row = lax.broadcasted_iota(jnp.int32, (n_pad, 1), 0)
            ym = jnp.where(row < n_true, y, 0.0)
            s1 = jnp.sum(ym, axis=0, keepdims=True)
            s2 = jnp.sum(ym * y, axis=0, keepdims=True)

        mean = s1 * inv_n
        # One-pass biased variance; clamp against negative round-off before rsqrt.
        var = jnp.maximum(s2 * inv_n - mean * mean, 0.0)
        scale = g_ref[...] * lax.rsqrt(var + BN_EPS)          # fused BN affine: one FMA/elem
        shift = beta_ref[...] - mean * scale
        o_ref[...] = (y * scale + shift).astype(o_ref.dtype)


def _pick_tiles(n_pad, cin, cout_pad, elem_in, budget, small_batch):
    """Choose (tc, tk, cin_pad, w_buffers) that fit the per-generation VMEM budget."""

    def footprint(tc, tk, wbuf):
        return (2 * n_pad * tk * elem_in          # x block (double-buffered)
                + wbuf * tk * tc * elem_in        # W^T block (2- or 3-deep pipeline)
                + 2 * n_pad * tc * 4              # resident f32 output block + writeback buf
                + 2 * n_pad * tc * 4              # epilogue f32 temporaries headroom
                + 6 * tc * 4)                     # bias/gamma/beta blocks

    tc_cands = [c for c in (1024, 512, 256, 128) if c <= cout_pad and cout_pad % c == 0]
    if not tc_cands:
        tc_cands = [cout_pad]
    # Prefer >=2 Cout tiles so the "parallel" axis feeds both v7x TensorCores.
    multi = [c for c in tc_cands if cout_pad // c >= 2]
    if multi:
        tc_cands = multi

    # 1) Single K step (tk = Cin, unpadded): x fetched exactly once, no accumulation loop.
    for tc in tc_cands:
        if footprint(tc, cin, 2) <= budget:
            return tc, cin, cin, 2

    # 2) Tiled K (128-aligned).
    cin_pad = _round_up(cin, 128)
    tk_cands = [t for t in (2048, 1024, 512, 256, 128) if t <= cin_pad and cin_pad % t == 0]
    if not tk_cands:
        tk_cands = [128]
    wbuf = 3 if small_batch else 2
    for tc in tc_cands:
        for tk in tk_cands:
            if footprint(tc, tk, wbuf) <= budget:
                return tc, tk, cin_pad, wbuf

    # TODO(synk): if even (128,128) tiles exceed the budget (huge N), exact single-pass batch
    #             stats require a two-pass BN with N tiling; fall back and let the compiler cope.
    return 128, min(128, cin_pad), cin_pad, 2


def single_fc_block(x, w, b, gamma, beta, *, mxu_dtype=jnp.bfloat16):
    """Fused Linear -> ReLU -> BatchNorm1d (training-mode batch statistics).

    x: (N, Cin); w: (Cout, Cin) (PyTorch nn.Linear layout); b/gamma/beta: (Cout,).
    mxu_dtype: dtype fed to the MXU (default bf16; pass None to keep the input dtype).
               Accumulation and the BN epilogue are always f32.
    """
    n, cin = x.shape
    cout, cin_w = w.shape
    assert cin_w == cin
    out_dtype = x.dtype

    in_dtype = x.dtype if mxu_dtype is None else jnp.dtype(mxu_dtype) if hasattr(jnp, "dtype") else mxu_dtype
    in_dtype = x.dtype if mxu_dtype is None else mxu_dtype
    elem_in = np.dtype(in_dtype).itemsize

    # ---- TPU-friendly padded shapes -------------------------------------------------
    # Sub-32-bit dtypes pack 2/4 rows per sublane -> align N accordingly.
    n_align = 8 if elem_in >= 4 else (16 if elem_in == 2 else 32)
    n_pad = _round_up(n, n_align)
    cout_pad = _round_up(cout, 128)               # lane-dense output stores

    # ---- Generation-aware VMEM budget ------------------------------------------------
    try:
        vmem_cap = int(getattr(pltpu.get_tpu_info(), "vmem_capacity_bytes", 64 << 20))
    except Exception:
        vmem_cap = 64 << 20                       # conservative (v7x per-TensorCore)
    budget = max(vmem_cap - (16 << 20), 16 << 20)

    small_batch = n_pad <= 256                    # weight-bandwidth-bound regime
    tc, tk, cin_pad, w_buffers = _pick_tiles(n_pad, cin, cout_pad, elem_in, budget, small_batch)
    num_cout_tiles = cout_pad // tc
    num_k_tiles = cin_pad // tk
    if num_k_tiles < 3:
        w_buffers = 2                             # deep W pipeline only pays off with many K steps

    # ---- One-time HBM prep (pad / transpose / cast) -----------------------------------
    # TODO(synk): for weight-stationary reuse, pre-transpose/pad/cast W and the BN params once at
    #             model init instead of on every forward call.
    w_t = jnp.transpose(w)                        # (Cin, Cout): plain MXU dot, no in-kernel transpose
    if (n_pad, cin_pad) != (n, cin):
        x = jnp.pad(x, ((0, n_pad - n), (0, cin_pad - cin)))
    if (cin_pad, cout_pad) != (cin, cout):
        w_t = jnp.pad(w_t, ((0, cin_pad - cin), (0, cout_pad - cout)))
    if cout_pad != cout:
        b = jnp.pad(b, (0, cout_pad - cout))
        gamma = jnp.pad(gamma, (0, cout_pad - cout))
        beta = jnp.pad(beta, (0, cout_pad - cout))
    b2 = b.reshape(1, cout_pad).astype(jnp.float32)
    g2 = gamma.reshape(1, cout_pad).astype(jnp.float32)
    be2 = beta.reshape(1, cout_pad).astype(jnp.float32)

    if mxu_dtype is not None:
        x = x.astype(mxu_dtype)
        w_t = w_t.astype(mxu_dtype)

    # ---- VMEM footprint / limit --------------------------------------------------------
    footprint = (2 * n_pad * tk * elem_in + w_buffers * tk * tc * elem_in
                 + 4 * n_pad * tc * 4 + 6 * tc * 4)
    vmem_limit = int(min(max(footprint + (8 << 20), 32 << 20), vmem_cap - (8 << 20)))

    # ---- BlockSpecs ---------------------------------------------------------------------
    w_spec_kwargs = {}
    if w_buffers > 2:
        w_spec_kwargs["pipeline_mode"] = pl.Buffered(w_buffers)
    in_specs = [
        pl.BlockSpec((n_pad, tk), lambda j, k: (0, k)),               # x K-slice (fetched once if single K step)
        pl.BlockSpec((tk, tc), lambda j, k: (k, j), **w_spec_kwargs),  # W^T tile
        pl.BlockSpec((1, tc), lambda j, k: (0, j)),                    # bias
        pl.BlockSpec((1, tc), lambda j, k: (0, j)),                    # gamma
        pl.BlockSpec((1, tc), lambda j, k: (0, j)),                    # beta
    ]
    out_spec = pl.BlockSpec((n_pad, tc), lambda j, k: (0, j))          # resident across the K axis

    # x is refetched per Cout tile only when K is tiled (block index changes back to k=0).
    x_passes = 1 if num_k_tiles == 1 else num_cout_tiles
    cost = pl.CostEstimate(
        flops=2 * n_pad * cin_pad * cout_pad + 10 * n_pad * cout_pad,
        transcendentals=cout_pad,
        bytes_accessed=(elem_in * n_pad * cin_pad * x_passes
                        + elem_in * cin_pad * cout_pad
                        + 4 * n_pad * cout_pad
                        + 3 * 4 * cout_pad),
    )

    kernel = functools.partial(_fc_bn_kernel, n_true=n)

    out = pl.pallas_call(
        kernel,
        out_shape=jax.ShapeDtypeStruct((n_pad, cout_pad), jnp.float32),
        grid_spec=pltpu.PrefetchScalarGridSpec(
            num_scalar_prefetch=0,
            grid=(num_cout_tiles, num_k_tiles),
            in_specs=in_specs,
            out_specs=out_spec,
        ),
        compiler_params=pltpu.CompilerParams(
            dimension_semantics=("parallel", "arbitrary"),
            vmem_limit_bytes=vmem_limit,
        ),
        cost_estimate=cost,
    )(x, w_t, b2, g2, be2)

    if (n_pad, cout_pad) != (n, cout):
        out = out[:n, :cout]
    if out.dtype != out_dtype:
        out = out.astype(out_dtype)
    return out


def _reference(x, w, b, gamma, beta):
    y = jnp.maximum(x @ w.T + b, 0.0)
    mean = jnp.mean(y, axis=0, keepdims=True)
    var = jnp.mean((y - mean) ** 2, axis=0, keepdims=True)
    return (y - mean) / jnp.sqrt(var + BN_EPS) * gamma + beta


if __name__ == "__main__":
    key = jax.random.PRNGKey(0)
    k_x, k_w, k_b, k_g, k_be = jax.random.split(key, 5)

    N, CIN, COUT = 8, 16, 32
    x = jax.random.normal(k_x, (N, CIN), dtype=jnp.float32)
    # Synthetic params with nn.Linear(CIN, COUT) + nn.BatchNorm1d(COUT) shapes.
    w = jax.random.normal(k_w, (COUT, CIN), dtype=jnp.float32) * 0.1
    b = jax.random.normal(k_b, (COUT,), dtype=jnp.float32) * 0.1
    gamma = 1.0 + 0.1 * jax.random.normal(k_g, (COUT,), dtype=jnp.float32)
    beta = 0.1 * jax.random.normal(k_be, (COUT,), dtype=jnp.float32)

    ref = _reference(x, w, b, gamma, beta)

    # f32 MXU feed: bit-accurate check of the fused kernel math.
    out_f32 = jax.block_until_ready(single_fc_block(x, w, b, gamma, beta, mxu_dtype=None))
    assert out_f32.shape == (N, COUT)
    assert jnp.allclose(out_f32, ref, atol=1e-4, rtol=1e-4), "f32 path mismatch vs JAX reference"

    # Default bf16 MXU feed (f32 accumulation/epilogue): expect bf16-level error vs f32 reference.
    out_bf16 = jax.block_until_ready(single_fc_block(x, w, b, gamma, beta))
    assert out_bf16.shape == (N, COUT)
    assert jnp.allclose(out_bf16, ref, atol=5e-2, rtol=5e-2), "bf16 path mismatch vs JAX reference"

    print("KERNEL_OK")
</pallas_src>

<mosaic_0001>
module attributes {stable_mosaic.version = 11 : i64} {
  func.func @_fc_bn_kernel(%arg0: i32, %arg1: i32, %arg2: memref<8x16xf32, #tpu.memory_space<vmem>>, %arg3: memref<16x128xf32, #tpu.memory_space<vmem>>, %arg4: memref<1x128xf32, #tpu.memory_space<vmem>>, %arg5: memref<1x128xf32, #tpu.memory_space<vmem>>, %arg6: memref<1x128xf32, #tpu.memory_space<vmem>>, %arg7: memref<8x128xf32, #tpu.memory_space<vmem>>) attributes {dimension_semantics = [#tpu.dimension_semantics<parallel>, #tpu.dimension_semantics<arbitrary>], iteration_bounds = array<i64: 1, 1>, scalar_prefetch = 0 : i64, scratch_operands = 0 : i64, tpu.core_type = #tpu.core_type<tc>, window_params = [{transform_indices = @transform_0, window_bounds = array<i64: 8, 16>}, {transform_indices = @transform_1, window_bounds = array<i64: 16, 128>}, {transform_indices = @transform_2, window_bounds = array<i64: 1, 128>}, {transform_indices = @transform_3, window_bounds = array<i64: 1, 128>}, {transform_indices = @transform_4, window_bounds = array<i64: 1, 128>}, {transform_indices = @transform_5, window_bounds = array<i64: 8, 128>}]} {
    %c0 = arith.constant 0 : index
    %c0_0 = arith.constant 0 : index
    %0 = vector.load %arg2[%c0, %c0_0] : memref<8x16xf32, #tpu.memory_space<vmem>>, vector<8x16xf32>
    %c0_1 = arith.constant 0 : index
    %c0_2 = arith.constant 0 : index
    %1 = vector.load %arg3[%c0_1, %c0_2] : memref<16x128xf32, #tpu.memory_space<vmem>>, vector<16x128xf32>
    %cst = arith.constant dense<0.000000e+00> : vector<8x128xf32>
    %2 = tpu.matmul %0, %1, %cst {dimension_numbers = #tpu.dot_dimension_numbers<[1], [0], [0], [1], [0, 0, 1, 1], [], []>} : vector<8x16xf32>, vector<16x128xf32>, vector<8x128xf32> -> vector<8x128xf32>
    %c0_i32 = arith.constant 0 : i32
    %3 = arith.cmpi eq, %arg1, %c0_i32 : i32
    %4 = arith.extui %3 : i1 to i32
    %c0_i32_3 = arith.constant 0 : i32
    %5 = arith.cmpi ne, %4, %c0_i32_3 : i32
    scf.if %5 {
      %c0_8 = arith.constant 0 : index
      %c0_9 = arith.constant 0 : index
      %12 = vector.load %arg7[%c0_8, %c0_9] : memref<8x128xf32, #tpu.memory_space<vmem>>, vector<8x128xf32>
      tpu.vector_store %arg7[%c0_8, %c0_9], %2 {strides = array<i32>} : memref<8x128xf32, #tpu.memory_space<vmem>>, vector<8x128xf32>,
    } else {
    }
    %c0_i32_4 = arith.constant 0 : i32
    %6 = arith.cmpi ne, %arg1, %c0_i32_4 : i32
    %7 = arith.extui %6 : i1 to i32
    %c0_i32_5 = arith.constant 0 : i32
    %8 = arith.cmpi ne, %7, %c0_i32_5 : i32
    scf.if %8 {
      %c0_8 = arith.constant 0 : index
      %c0_9 = arith.constant 0 : index
      %12 = vector.load %arg7[%c0_8, %c0_9] : memref<8x128xf32, #tpu.memory_space<vmem>>, vector<8x128xf32>
      %13 = arith.addf %12, %2 : vector<8x128xf32>
      %c0_10 = arith.constant 0 : index
      %c0_11 = arith.constant 0 : index
      %14 = vector.load %arg7[%c0_10, %c0_11] : memref<8x128xf32, #tpu.memory_space<vmem>>, vector<8x128xf32>
      tpu.vector_store %arg7[%c0_10, %c0_11], %13 {strides = array<i32>} : memref<8x128xf32, #tpu.memory_space<vmem>>, vector<8x128xf32>,
    } else {
    }
    %c0_i32_6 = arith.constant 0 : i32
    %9 = arith.cmpi eq, %arg1, %c0_i32_6 : i32
    %10 = arith.extui %9 : i1 to i32
    %c0_i32_7 = arith.constant 0 : i32
    %11 = arith.cmpi ne, %10, %c0_i32_7 : i32
    scf.if %11 {
      %c0_8 = arith.constant 0 : index
      %c0_9 = arith.constant 0 : index
      %12 = vector.load %arg7[%c0_8, %c0_9] : memref<8x128xf32, #tpu.memory_space<vmem>>, vector<8x128xf32>
      %c0_10 = arith.constant 0 : index
      %c0_11 = arith.constant 0 : index
      %13 = vector.load %arg4[%c0_10, %c0_11] : memref<1x128xf32, #tpu.memory_space<vmem>>, vector<1x128xf32>
      %14 = vector.broadcast %13 : vector<1x128xf32> to vector<8x128xf32>
      %15 = arith.addf %12, %14 : vector<8x128xf32>
      %cst_12 = arith.constant 0.000000e+00 : f32
      %16 = vector.broadcast %cst_12 : f32 to vector<8x128xf32>
      %17 = arith.maximumf %15, %16 : vector<8x128xf32>
      %cst_13 = arith.constant dense<0.000000e+00> : vector<128xf32>
      %18 = vector.multi_reduction <add>, %17, %cst_13 [0] : vector<8x128xf32> to vector<128xf32>
      %19 = vector.shape_cast %18 : vector<128xf32> to vector<1x128xf32>
      %20 = arith.mulf %17, %17 : vector<8x128xf32>
      %cst_14 = arith.constant dense<0.000000e+00> : vector<128xf32>
      %21 = vector.multi_reduction <add>, %20, %cst_14 [0] : vector<8x128xf32> to vector<128xf32>
      %22 = vector.shape_cast %21 : vector<128xf32> to vector<1x128xf32>
      %cst_15 = arith.constant 1.250000e-01 : f32
      %23 = vector.broadcast %cst_15 : f32 to vector<1x128xf32>
      %24 = arith.mulf %19, %23 : vector<1x128xf32>
      %cst_16 = arith.constant 1.250000e-01 : f32
      %25 = vector.broadcast %cst_16 : f32 to vector<1x128xf32>
      %26 = arith.mulf %22, %25 : vector<1x128xf32>
      %27 = arith.mulf %24, %24 : vector<1x128xf32>
      %28 = arith.subf %26, %27 : vector<1x128xf32>
      %cst_17 = arith.constant 0.000000e+00 : f32
      %29 = vector.broadcast %cst_17 : f32 to vector<1x128xf32>
      %30 = arith.maximumf %28, %29 : vector<1x128xf32>
      %c0_18 = arith.constant 0 : index
      %c0_19 = arith.constant 0 : index
      %31 = vector.load %arg5[%c0_18, %c0_19] : memref<1x128xf32, #tpu.memory_space<vmem>>, vector<1x128xf32>
      %cst_20 = arith.constant 9.99999974E-6 : f32
      %32 = vector.broadcast %cst_20 : f32 to vector<1x128xf32>
      %33 = arith.addf %30, %32 : vector<1x128xf32>
      %34 = math.rsqrt %33 : vector<1x128xf32>
      %35 = arith.mulf %31, %34 : vector<1x128xf32>
      %c0_21 = arith.constant 0 : index
      %c0_22 = arith.constant 0 : index
      %36 = vector.load %arg6[%c0_21, %c0_22] : memref<1x128xf32, #tpu.memory_space<vmem>>, vector<1x128xf32>
      %37 = arith.mulf %24, %35 : vector<1x128xf32>
      %38 = arith.subf %36, %37 : vector<1x128xf32>
      %39 = vector.broadcast %35 : vector<1x128xf32> to vector<8x128xf32>
      %40 = arith.mulf %17, %39 : vector<8x128xf32>
      %41 = vector.broadcast %38 : vector<1x128xf32> to vector<8x128xf32>
      %42 = arith.addf %40, %41 : vector<8x128xf32>
      %c0_23 = arith.constant 0 : index
      %c0_24 = arith.constant 0 : index
      %43 = vector.load %arg7[%c0_23, %c0_24] : memref<8x128xf32, #tpu.memory_space<vmem>>, vector<8x128xf32>
      tpu.vector_store %arg7[%c0_23, %c0_24], %42 {strides = array<i32>} : memref<8x128xf32, #tpu.memory_space<vmem>>, vector<8x128xf32>,
    } else {
    }
    return
  }
  func.func @transform_0(%arg0: i32, %arg1: i32) -> (i32, i32) {
    %c0_i32 = arith.constant 0 : i32
    %c0_i32_0 = arith.constant 0 : i32
    return %c0_i32, %arg1 : i32, i32
  }
  func.func @transform_1(%arg0: i32, %arg1: i32) -> (i32, i32) {
    %c0_i32 = arith.constant 0 : i32
    return %arg1, %arg0 : i32, i32
  }
  func.func @transform_2(%arg0: i32, %arg1: i32) -> (i32, i32) {
    %c0_i32 = arith.constant 0 : i32
    %c0_i32_0 = arith.constant 0 : i32
    return %c0_i32, %arg0 : i32, i32
  }
  func.func @transform_3(%arg0: i32, %arg1: i32) -> (i32, i32) {
    %c0_i32 = arith.constant 0 : i32
    %c0_i32_0 = arith.constant 0 : i32
    return %c0_i32, %arg0 : i32, i32
  }
  func.func @transform_4(%arg0: i32, %arg1: i32) -> (i32, i32) {
    %c0_i32 = arith.constant 0 : i32
    %c0_i32_0 = arith.constant 0 : i32
    return %c0_i32, %arg0 : i32, i32
  }
  func.func @transform_5(%arg0: i32, %arg1: i32) -> (i32, i32) {
    %c0_i32 = arith.constant 0 : i32
    %c0_i32_0 = arith.constant 0 : i32
    return %c0_i32, %arg0 : i32, i32
  }
}

</mosaic_0001>

<bundles_post_ra>
// kernel: tpu_custom_call.1
= control target key start
LH: loop header
LB: loop body
LE: loop exit
PB: predicated region body
PF: predicated region fallthrough
CT: control target
= control target key end

     0   :  { %10 = vsyncpa [#allocation3], 0  ;;  %s392_s0 = inlined_call_operand.hbm [shape: f32[8,16], index: 0, kind: input, shape index: {}]   ;;  %s393_s1 = inlined_call_operand.hbm [shape: f32[16,128], index: 1, kind: input, shape index: {}]   ;;  %s394_s2 = inlined_call_operand.vmem [shape: f32[1,128], index: 2, kind: input, shape index: {}]   ;;  %s395_s3 = inlined_call_operand.vmem [shape: f32[1,128], index: 3, kind: input, shape index: {}]   ;;  %s396_s4 = inlined_call_operand.vmem [shape: f32[1,128], index: 4, kind: input, shape index: {}]   ;;  %s397_s5 = inlined_call_operand.hbm [shape: f32[8,128], index: 5, kind: output, shape index: {}]  }
   0x1   :  { %11 = vsyncpa [#allocation6], 0 }
   0x2   :  { %12 = vsyncpa [#allocation4], 0  ;;  %s302_s18 = smov [#allocation2]   ;;  %s303_s20 = smov [#allocation5]  }
   0x3   :  { %s19_s19 = sshll.u32 %s302_s18, 4  ;;  %s28_s21 = sshll.u32 %s303_s20, 4  ;;  %s20_s19 = int_to_ptr.vmem [resolvable:$true] %s19_s19  ;;  %s340_s21 = int_to_ptr.vmem [resolvable:$true] %s28_s21 }
   0x4   :  { %s230_s24 = scalar_lea.hbm %s392_s0, 128 }
   0x5   :  { %p231_p0 = scmp.ne.s32.totalorder %s392_s0, %s230_s24  ;;  %p234_p1 = scmp.lt.u32.totalorder %s230_s24, %s392_s0 }
   0x7   :  { %p236_p2 = pnand %p234_p1, %p231_p0 }
   0x9   :  { %239 = shalt.err (!%p236_p2)
}
   0xa   :  { %s240_s29 = scalar_lea.vmem %s20_s19, 128  ;;  %p245_p4 = scmp.lt.s32.totalorder %s20_s19, %s20_s19 }
   0xb   :  { %p241_p3 = scmp.ne.s32.totalorder %s20_s19, %s240_s29  ;;  %p246_p5 = scmp.lt.s32.totalorder %s240_s29, %s240_s29 }
   0xd   :  { %p247_p6 = por %p246_p5, %p245_p4 }
   0xf   :  { %p248_p7 = pnand %p247_p6, %p241_p3 }
  0x11   :  { %251 = shalt.err (!%p248_p7)
}
  0x12   :  { %22 = dma.hbm_to_vmem [thread:$0]  %s392_s0, 128, %s20_s19, [#allocation3]  }
  0x13   :  { %s252_s9 = scalar_lea.hbm %s393_s1, 256 }
  0x14   :  { %p253_p8 = scmp.ne.s32.totalorder %s393_s1, %s252_s9  ;;  %p256_p9 = scmp.lt.u32.totalorder %s252_s9, %s393_s1 }
  0x16   :  { %p258_p10 = pnand %p256_p9, %p253_p8 }
  0x18   :  { %261 = shalt.err (!%p258_p10)
}
  0x19   :  { %s262_s14 = scalar_lea.vmem %s340_s21, 256  ;;  %p267_p12 = scmp.lt.s32.totalorder %s340_s21, %s340_s21 }
  0x1a   :  { %p263_p11 = scmp.ne.s32.totalorder %s340_s21, %s262_s14  ;;  %p268_p13 = scmp.lt.s32.totalorder %s262_s14, %s262_s14 }
  0x1c   :  { %p269_p0 = por %p268_p13, %p267_p12 }
  0x1e   :  { %p270_p1 = pnand %p269_p0, %p263_p11 }
  0x20   :  { %273 = shalt.err (!%p270_p1)
}
  0x21   :  { %s304_s0 = smov 128   ;;  %s305_s15 = smov 8  }
  0x22   :  { %34 = dma.hbm_to_vmem [thread:$0]  %s393_s1, 256, %s340_s21, [#allocation6], %s304_s0, %s304_s0, %s305_s15  }
  0x23   :  { %296 = dma.done.wait [#allocation3], 128  }
  0x24   :  { %297 = vsyncadd [#allocation3], 4294967168 }
  0x25   :  { %298 = dma.done.wait [#allocation6], 256  }
  0x26   :  { %299 = vsyncadd [#allocation6], 4294967040  ;;  %v306_v0 = vmov 0.0|0.0   ;;  %vm307_vm0 = vmmov 0   ;;  %v308_v1 = vmov 0.0   ;;  %v48_v2 = vld [vmem:[#allocation5] sm:$0xff]  ;;  %v175_v30 = vlaneseq }
  0x27   :  { %217 = vmatprep.subr.bf16.mxu0 %v306_v0  ;;  %214 = vmatprep.mubr.msk.f32.mxu0 %vm307_vm0, %v308_v1  ;;  %v49_v3 = vld [vmem:[#allocation5 + $0x8] sm:$0xff]  ;;  %v47_v5 = vld [vmem:[#allocation2] sm:$0xff]  ;;  %vm50_vm1 = vcmask 130048   ;;  %s309_s22 = smov [#allocation7]  }
  0x28   :  { %v218_v4 = vpack.c.bf16 %v49_v3, %v48_v2  ;;  %v206_v6 = vld [vmem:[%s394_s2] ss:$0 sm:$0xff]  ;;  %v176_v31 = vshrl.u32 %v175_v30, 7  ;;  %s195_s23 = sshll.u32 %s309_s22, 4  ;;  %s196_s23 = int_to_ptr.vmem [resolvable:$true] %s195_s23 }
  0x29   :  { %v167_v32 = vld [vmem:[%s395_s3] sm:$0x1]  ;;  %s274_s24 = scalar_lea.vmem %s196_s23, 128  ;;  %p279_p3 = scmp.lt.s32.totalorder %s196_s23, %s196_s23 }
  0x2a   :  { %219 = vmatpush3.bf16.msra.mxu0 %v218_v4  ;;  %v177_v33 = vsub.s32 0, %v176_v31  ;;  %v171_v36 = vld [vmem:[%s396_s4] sm:$0x1]  ;;  %p275_p2 = scmp.ne.s32.totalorder %s196_s23, %s274_s24  ;;  %p280_p4 = scmp.lt.s32.totalorder %s274_s24, %s274_s24 }
  0x2c   :  { %p281_p5 = por %p280_p4, %p279_p3 }
  0x2d   :  { %215 = vmatmul.mubr.msk.f32.vlgmr.msra.gmra.mrb[0].mxu0 %vm50_vm1, %v47_v5 }
  0x2e   :  { %p282_p6 = pnand %p281_p5, %p275_p2 }
 0x100   :  { %v120_v7 = vpop.f32.mrb[0].mxu0 }
 0x101   :  { %v216_v8 = vpop.f32.mrb[1].mxu0  ;;  %v147_v9 = vadd.f32 %v206_v6, %v120_v7 }
 0x103   :  { %v148_v10 = vmax.f32 %v147_v9, 0.0 }
 0x105   :  { %v149_v11 = vrot.slane %v148_v10, 4  ;;  %v155_v12 = vmul.f32 %v148_v10, %v148_v10 }
 0x107   :  { %v150_v13 = vadd.f32 %v149_v11, %v148_v10  ;;  %v156_v14 = vrot.slane %v155_v12, 4 }
 0x109   :  { %v151_v15 = vrot.slane %v150_v13, 2  ;;  %v157_v16 = vadd.f32 %v156_v14, %v155_v12 }
 0x10b   :  { %v152_v17 = vadd.f32 %v151_v15, %v150_v13  ;;  %v158_v18 = vrot.slane %v157_v16, 2 }
 0x10d   :  { %v153_v19 = vrot.slane %v152_v17, 1  ;;  %v159_v20 = vadd.f32 %v158_v18, %v157_v16 }
 0x10f   :  { %v154_v21 = vadd.f32 %v153_v19, %v152_v17  ;;  %v160_v22 = vrot.slane %v159_v20, 1 }
 0x111   :  { %v161_v23 = vadd.f32 %v160_v22, %v159_v20  ;;  %v162_v24 = vmul.f32 0.125, %v154_v21 }
 0x113   :  { %v163_v25 = vmul.f32 0.125, %v161_v23  ;;  %v164_v26 = vmul.f32 %v162_v24, %v162_v24 }
 0x115   :  { %v165_v27 = vsub.f32 %v163_v25, %v164_v26 }
 0x117   :  { %v166_v28 = vmax.f32 %v165_v27, 0.0 }
 0x119   :  { %v168_v29 = vadd.f32 1e-05, %v166_v28 }
 0x11b   :  { %228 = vrsqrt.f32 %v168_v29 }
 0x125   :  { %v229_v34 = vpop.eup %228 }
 0x126   :  { %v170_v35 = vmul.f32 %v229_v34, %v167_v32 }
 0x128   :  { %v172_v37 = vmul.f32 %v170_v35, %v162_v24  ;;  %v178_v38 = vrot.slane %v170_v35, %v177_v33 }
 0x12a   :  { %v173_v39 = vsub.f32 %v171_v36, %v172_v37  ;;  %v180_v40 = vmul.f32 %v178_v38, %v148_v10 }
 0x12c   :  { %v185_v41 = vrot.slane %v173_v39, %v177_v33 }
 0x12e   :  { %v187_v42 = vadd.f32 %v185_v41, %v180_v40 }
 0x130   :  { %188 = vst [vmem:[#allocation7] sm:$0xff] %v187_v42 }
 0x131   :  { %285 = shalt.err (!%p282_p6)
}
 0x132   :  { %s286_s4 = scalar_lea.hbm %s397_s5, 128 }
 0x133   :  { %p287_p7 = scmp.ne.s32.totalorder %s397_s5, %s286_s4  ;;  %p290_p8 = scmp.lt.u32.totalorder %s286_s4, %s397_s5 }
 0x135   :  { %p292_p9 = pnand %p290_p8, %p287_p7 }
 0x137   :  { %295 = shalt.err (!%p292_p9)
}
 0x138   :  { %198 = dma.vmem_to_hbm [thread:$0]  %s196_s23, 128, %s397_s5, [#allocation4]  }
 0x139   :  { %300 = dma.done.wait [#allocation4], 128  }
 0x13a   :  { %301 = vsyncadd [#allocation4], 4294967168 }
 0x13b   :  { %202 = vsyncpa [#allocation3], 1 }
 0x13c   :  { %203 = vsyncpa [#allocation6], 1 }
 0x13d   :  { %204 = vsyncpa [#allocation4], 1 }

</bundles_post_ra>
